<compile_context>
chip_gen: v5e
topology: v5e:2x2
jax: 0.10.0
libtpu: 0.0.40
codegen_flags: <defaults>
</compile_context>

<pallas_src>
import functools

import jax
import jax.numpy as jnp
from jax import lax
from jax.experimental import pallas as pl
from jax.experimental.pallas import tpu as pltpu

_EPS = 1e-7  # torchvision.ops.generalized_box_iou_loss default eps


def _round_up(x, m):
    return ((x + m - 1) // m) * m


def _cdiv(a, b):
    return -(-a // b)


def _bbox_loss_kernel(pred_ref, targ_ref, out_ref, *, cost_iou, cost_l1):
    # pred_ref / targ_ref: (T4, 128) f32 blocks of the flat interleaved box
    # stream (32 boxes per 128-lane row).  out_ref: (T4, 32) f32 where
    # out[r, m] is the loss of box 32*r + m (block-local row index r).
    p = pred_ref[...]
    t = targ_ref[...]

    # Align y1/x2/y2 onto the x1 lanes (lanes 4m) with lane rotations.
    # np.roll semantics: shift = 128 - k  =>  out[l] = in[(l + k) % 128].
    def split(v):
        return (v,
                pltpu.roll(v, 127, 1),   # lane l <- v[l + 1]
                pltpu.roll(v, 126, 1),   # lane l <- v[l + 2]
                pltpu.roll(v, 125, 1))   # lane l <- v[l + 3]

    x1, y1, x2, y2 = split(p)
    x1g, y1g, x2g, y2g = split(t)

    # ---- GIoU loss (torchvision: strict > mask, eps placement) ----
    xkis1 = jnp.maximum(x1, x1g)
    ykis1 = jnp.maximum(y1, y1g)
    xkis2 = jnp.minimum(x2, x2g)
    ykis2 = jnp.minimum(y2, y2g)
    inter = jnp.where((ykis2 > ykis1) & (xkis2 > xkis1),
                      (xkis2 - xkis1) * (ykis2 - ykis1),
                      jnp.zeros_like(p))
    union = (x2 - x1) * (y2 - y1) + (x2g - x1g) * (y2g - y1g) - inter
    iou = inter / (union + _EPS)
    area_c = (jnp.maximum(x2, x2g) - jnp.minimum(x1, x1g)) * \
             (jnp.maximum(y2, y2g) - jnp.minimum(y1, y1g))
    giou = iou - (area_c - union) / (area_c + _EPS)
    loss_iou = 1.0 - giou

    # ---- L1 loss, mean over the 4 coordinates ----
    l1 = (jnp.abs(x1 - x1g) + jnp.abs(y1 - y1g)
          + jnp.abs(x2 - x2g) + jnp.abs(y2 - y2g)) * 0.25

    loss = cost_iou * loss_iou + cost_l1 * l1

    # Only lanes 4m carry a real box; the other lanes hold misaligned garbage
    # (possibly NaN/Inf from the divides) and must be zeroed with a select
    # (not a multiply) before the compaction matmul.
    lane = lax.broadcasted_iota(jnp.int32, loss.shape, 1)
    loss = jnp.where((lane & 3) == 0, loss, jnp.zeros_like(loss))

    # 128-lane interleaved -> 32-lane box-dense compaction via a 0/1 selection
    # matmul on the (otherwise idle) MXU.  Exact: each output is one selected
    # f32 value plus exact zeros.  (Note: an Inf/NaN loss from a malformed box
    # would smear over its 32-box row; well-formed boxes are always finite.)
    l_idx = lax.broadcasted_iota(jnp.int32, (128, 32), 0)
    m_idx = lax.broadcasted_iota(jnp.int32, (128, 32), 1)
    sel = (l_idx == 4 * m_idx).astype(jnp.float32)
    out_ref[...] = jnp.dot(loss, sel, preferred_element_type=jnp.float32)


def my_bbox_loss(pred_bbox, targ_bbox, cost_iou=1.0, cost_l1=1.0,
                 block_rows=1024):
    """pred_bbox: (B, M, 4), targ_bbox: (B, N, 4) -> (B, N) float32."""
    pred = pred_bbox.astype(jnp.float32)
    targ = targ_bbox.astype(jnp.float32)
    if pred.shape != targ.shape:
        # TODO(synk): express size-1 (M==1 / N==1) broadcasts via the BlockSpec
        # index_map instead of materializing the expanded operand in HBM.
        pred, targ = jnp.broadcast_arrays(pred, targ)
    B, N = pred.shape[0], pred.shape[1]
    P = B * N                              # number of box pairs
    if P == 0:
        return jnp.zeros((B, N), jnp.float32)
    R4 = _cdiv(P, 32)                      # 128-lane rows of interleaved coords

    def as_rows(x):
        flat = x.reshape(-1)               # free: (B, N, 4) is contiguous
        if P % 32:
            # Only the ragged tail row needs zero boxes (loss=finite, sliced
            # off below).  TODO(synk): a producer keeping B*N a multiple of 32
            # makes this a pure zero-copy reshape (the pad is one extra pass).
            flat = jnp.pad(flat, (0, R4 * 128 - flat.shape[0]))
        return flat.reshape(R4, 128)

    pred_r = as_rows(pred)
    targ_r = as_rows(targ)

    # Row tiling: one step for small inputs (per-step overhead dominates);
    # otherwise >= 2 steps so v7x megacore can split the parallel grid axis.
    if R4 <= 16:
        t4, n_blocks = R4, 1
    else:
        t4 = min(int(block_rows), _round_up(_cdiv(R4, 2), 8))
        t4 = _round_up(t4, 8)
        n_blocks = _cdiv(R4, t4)           # ragged last block handled by Pallas

    kernel = functools.partial(_bbox_loss_kernel,
                               cost_iou=float(cost_iou),
                               cost_l1=float(cost_l1))

    out_rows = pl.pallas_call(
        kernel,
        out_shape=jax.ShapeDtypeStruct((R4, 32), jnp.float32),
        grid=(n_blocks,),
        in_specs=[
            pl.BlockSpec((t4, 128), lambda i: (i, 0)),
            pl.BlockSpec((t4, 128), lambda i: (i, 0)),
        ],
        out_specs=pl.BlockSpec((t4, 32), lambda i: (i, 0)),
        compiler_params=pltpu.CompilerParams(
            dimension_semantics=("parallel",)),
        cost_estimate=pl.CostEstimate(
            flops=500 * P, transcendentals=0, bytes_accessed=36 * P),
    )(pred_r, targ_r)

    out_flat = out_rows.reshape(-1)
    if R4 * 32 != P:                       # drop padded tail boxes
        out_flat = out_flat[:P]
    return out_flat.reshape(B, N)


def _reference(pred, targ, cost_iou=1.0, cost_l1=1.0):
    """Pure-JAX reference mirroring torchvision generalized_box_iou_loss + L1."""
    pred, targ = jnp.broadcast_arrays(pred.astype(jnp.float32),
                                      targ.astype(jnp.float32))
    x1, y1, x2, y2 = [pred[..., i] for i in range(4)]
    x1g, y1g, x2g, y2g = [targ[..., i] for i in range(4)]
    xkis1, ykis1 = jnp.maximum(x1, x1g), jnp.maximum(y1, y1g)
    xkis2, ykis2 = jnp.minimum(x2, x2g), jnp.minimum(y2, y2g)
    inter = jnp.where((ykis2 > ykis1) & (xkis2 > xkis1),
                      (xkis2 - xkis1) * (ykis2 - ykis1), 0.0)
    union = (x2 - x1) * (y2 - y1) + (x2g - x1g) * (y2g - y1g) - inter
    iou = inter / (union + _EPS)
    area_c = (jnp.maximum(x2, x2g) - jnp.minimum(x1, x1g)) * \
             (jnp.maximum(y2, y2g) - jnp.minimum(y1, y1g))
    giou = iou - (area_c - union) / (area_c + _EPS)
    loss_iou = 1.0 - giou
    l1 = jnp.abs(pred - targ).mean(-1)
    return cost_iou * loss_iou + cost_l1 * l1


if __name__ == "__main__":
    key = jax.random.PRNGKey(0)
    k1, k2 = jax.random.split(key)

    def make_boxes(k, B, N):
        # Well-formed boxes (x1 < x2, y1 < y2), deterministic.
        xy = jax.random.uniform(k, (B, N, 2), minval=0.0, maxval=0.5)
        wh = jax.random.uniform(jax.random.fold_in(k, 1), (B, N, 2),
                                minval=0.1, maxval=0.5)
        return jnp.concatenate([xy, xy + wh], axis=-1).astype(jnp.float32)

    # Check 1: small, 32-aligned box count -> zero-copy reshape, single block.
    B, N = 2, 64
    pred_bbox = make_boxes(k1, B, N)   # (2, 64, 4)
    targ_bbox = make_boxes(k2, B, N)   # (2, 64, 4)
    out = jax.block_until_ready(
        my_bbox_loss(pred_bbox, targ_bbox, cost_iou=1.0, cost_l1=1.0))
    ref = _reference(pred_bbox, targ_bbox, 1.0, 1.0)
    assert out.shape == (B, N), out.shape
    assert jnp.allclose(out, ref, atol=1e-5, rtol=1e-5)

    # Check 2: B*N not a multiple of 32 (padded tail) and a small block_rows
    # forcing a multi-step grid with a ragged last block.
    B2, N2 = 2, 600
    k3, k4 = jax.random.split(jax.random.fold_in(key, 7))
    pred2 = make_boxes(k3, B2, N2)
    targ2 = make_boxes(k4, B2, N2)
    out2 = jax.block_until_ready(
        my_bbox_loss(pred2, targ2, cost_iou=1.5, cost_l1=0.5, block_rows=8))
    ref2 = _reference(pred2, targ2, 1.5, 0.5)
    assert out2.shape == (B2, N2), out2.shape
    assert jnp.allclose(out2, ref2, atol=1e-5, rtol=1e-5)

    print("KERNEL_OK")
</pallas_src>

<mosaic_0001>
module attributes {stable_mosaic.version = 11 : i64} {
  func.func @_bbox_loss_kernel(%arg0: i32, %arg1: memref<4x128xf32, #tpu.memory_space<vmem>>, %arg2: memref<4x128xf32, #tpu.memory_space<vmem>>, %arg3: memref<4x32xf32, #tpu.memory_space<vmem>>) attributes {dimension_semantics = [#tpu.dimension_semantics<parallel>], iteration_bounds = array<i64: 1>, scalar_prefetch = 0 : i64, scratch_operands = 0 : i64, tpu.core_type = #tpu.core_type<tc>, window_params = [{transform_indices = @transform_0, window_bounds = array<i64: 4, 128>}, {transform_indices = @transform_1, window_bounds = array<i64: 4, 128>}, {transform_indices = @transform_2, window_bounds = array<i64: 4, 32>}]} {
    %c0 = arith.constant 0 : index
    %c0_0 = arith.constant 0 : index
    %0 = vector.load %arg1[%c0, %c0_0] : memref<4x128xf32, #tpu.memory_space<vmem>>, vector<4x128xf32>
    %c0_1 = arith.constant 0 : index
    %c0_2 = arith.constant 0 : index
    %1 = vector.load %arg2[%c0_1, %c0_2] : memref<4x128xf32, #tpu.memory_space<vmem>>, vector<4x128xf32>
    %c127_i32 = arith.constant 127 : i32
    %2 = tpu.dynamic_rotate %0 by %c127_i32 dim 1 : vector<4x128xf32>, i32 -> vector<4x128xf32>
    %c126_i32 = arith.constant 126 : i32
    %3 = tpu.dynamic_rotate %0 by %c126_i32 dim 1 : vector<4x128xf32>, i32 -> vector<4x128xf32>
    %c125_i32 = arith.constant 125 : i32
    %4 = tpu.dynamic_rotate %0 by %c125_i32 dim 1 : vector<4x128xf32>, i32 -> vector<4x128xf32>
    %c127_i32_3 = arith.constant 127 : i32
    %5 = tpu.dynamic_rotate %1 by %c127_i32_3 dim 1 : vector<4x128xf32>, i32 -> vector<4x128xf32>
    %c126_i32_4 = arith.constant 126 : i32
    %6 = tpu.dynamic_rotate %1 by %c126_i32_4 dim 1 : vector<4x128xf32>, i32 -> vector<4x128xf32>
    %c125_i32_5 = arith.constant 125 : i32
    %7 = tpu.dynamic_rotate %1 by %c125_i32_5 dim 1 : vector<4x128xf32>, i32 -> vector<4x128xf32>
    %8 = arith.maximumf %0, %1 : vector<4x128xf32>
    %9 = arith.maximumf %2, %5 : vector<4x128xf32>
    %10 = arith.minimumf %3, %6 : vector<4x128xf32>
    %11 = arith.minimumf %4, %7 : vector<4x128xf32>
    %12 = arith.cmpf ogt, %11, %9 : vector<4x128xf32>
    %13 = arith.cmpf ogt, %10, %8 : vector<4x128xf32>
    %14 = arith.andi %12, %13 : vector<4x128xi1>
    %15 = arith.subf %10, %8 : vector<4x128xf32>
    %16 = arith.subf %11, %9 : vector<4x128xf32>
    %17 = arith.mulf %15, %16 : vector<4x128xf32>
    %cst = arith.constant 0.000000e+00 : f32
    %18 = vector.broadcast %cst : f32 to vector<4x128xf32>
    %19 = arith.select %14, %17, %18 : vector<4x128xi1>, vector<4x128xf32>
    %20 = arith.subf %3, %0 : vector<4x128xf32>
    %21 = arith.subf %4, %2 : vector<4x128xf32>
    %22 = arith.mulf %20, %21 : vector<4x128xf32>
    %23 = arith.subf %6, %1 : vector<4x128xf32>
    %24 = arith.subf %7, %5 : vector<4x128xf32>
    %25 = arith.mulf %23, %24 : vector<4x128xf32>
    %26 = arith.addf %22, %25 : vector<4x128xf32>
    %27 = arith.subf %26, %19 : vector<4x128xf32>
    %cst_6 = arith.constant 1.000000e-07 : f32
    %28 = vector.broadcast %cst_6 : f32 to vector<4x128xf32>
    %29 = arith.addf %27, %28 : vector<4x128xf32>
    %30 = arith.divf %19, %29 : vector<4x128xf32>
    %31 = arith.maximumf %3, %6 : vector<4x128xf32>
    %32 = arith.minimumf %0, %1 : vector<4x128xf32>
    %33 = arith.subf %31, %32 : vector<4x128xf32>
    %34 = arith.maximumf %4, %7 : vector<4x128xf32>
    %35 = arith.minimumf %2, %5 : vector<4x128xf32>
    %36 = arith.subf %34, %35 : vector<4x128xf32>
    %37 = arith.mulf %33, %36 : vector<4x128xf32>
    %38 = arith.subf %37, %27 : vector<4x128xf32>
    %cst_7 = arith.constant 1.000000e-07 : f32
    %39 = vector.broadcast %cst_7 : f32 to vector<4x128xf32>
    %40 = arith.addf %37, %39 : vector<4x128xf32>
    %41 = arith.divf %38, %40 : vector<4x128xf32>
    %42 = arith.subf %30, %41 : vector<4x128xf32>
    %cst_8 = arith.constant 1.000000e+00 : f32
    %43 = vector.broadcast %cst_8 : f32 to vector<4x128xf32>
    %44 = arith.subf %43, %42 : vector<4x128xf32>
    %45 = arith.subf %0, %1 : vector<4x128xf32>
    %46 = math.absf %45 : vector<4x128xf32>
    %47 = arith.subf %2, %5 : vector<4x128xf32>
    %48 = math.absf %47 : vector<4x128xf32>
    %49 = arith.addf %46, %48 : vector<4x128xf32>
    %50 = arith.subf %3, %6 : vector<4x128xf32>
    %51 = math.absf %50 : vector<4x128xf32>
    %52 = arith.addf %49, %51 : vector<4x128xf32>
    %53 = arith.subf %4, %7 : vector<4x128xf32>
    %54 = math.absf %53 : vector<4x128xf32>
    %55 = arith.addf %52, %54 : vector<4x128xf32>
    %cst_9 = arith.constant 2.500000e-01 : f32
    %56 = vector.broadcast %cst_9 : f32 to vector<4x128xf32>
    %57 = arith.mulf %55, %56 : vector<4x128xf32>
    %cst_10 = arith.constant 1.000000e+00 : f32
    %58 = vector.broadcast %cst_10 : f32 to vector<4x128xf32>
    %59 = arith.mulf %58, %44 : vector<4x128xf32>
    %cst_11 = arith.constant 1.000000e+00 : f32
    %60 = vector.broadcast %cst_11 : f32 to vector<4x128xf32>
    %61 = arith.mulf %60, %57 : vector<4x128xf32>
    %62 = arith.addf %59, %61 : vector<4x128xf32>
    %63 = tpu.iota {dimensions = array<i32: 1>} : vector<4x128xi32>
    %c3_i32 = arith.constant 3 : i32
    %64 = vector.broadcast %c3_i32 : i32 to vector<4x128xi32>
    %65 = arith.andi %63, %64 : vector<4x128xi32>
    %c0_i32 = arith.constant 0 : i32
    %66 = vector.broadcast %c0_i32 : i32 to vector<4x128xi32>
    %67 = arith.cmpi eq, %65, %66 : vector<4x128xi32>
    %cst_12 = arith.constant 0.000000e+00 : f32
    %68 = vector.broadcast %cst_12 : f32 to vector<4x128xf32>
    %69 = arith.select %67, %62, %68 : vector<4x128xi1>, vector<4x128xf32>
    %70 = tpu.iota {dimensions = array<i32: 0>} : vector<128x32xi32>
    %71 = tpu.iota {dimensions = array<i32: 1>} : vector<128x32xi32>
    %c4_i32 = arith.constant 4 : i32
    %72 = vector.broadcast %c4_i32 : i32 to vector<128x32xi32>
    %73 = arith.muli %72, %71 : vector<128x32xi32>
    %74 = arith.cmpi eq, %70, %73 : vector<128x32xi32>
    %75 = arith.extui %74 : vector<128x32xi1> to vector<128x32xi32>
    %76 = arith.sitofp %75 : vector<128x32xi32> to vector<128x32xf32>
    %cst_13 = arith.constant dense<0.000000e+00> : vector<4x32xf32>
    %77 = tpu.matmul %69, %76, %cst_13 {dimension_numbers = #tpu.dot_dimension_numbers<[1], [0], [0], [1], [0, 0, 1, 1], [], []>} : vector<4x128xf32>, vector<128x32xf32>, vector<4x32xf32> -> vector<4x32xf32>
    %c0_14 = arith.constant 0 : index
    %c0_15 = arith.constant 0 : index
    %78 = vector.load %arg3[%c0_14, %c0_15] : memref<4x32xf32, #tpu.memory_space<vmem>>, vector<4x32xf32>
    tpu.vector_store %arg3[%c0_14, %c0_15], %77 {strides = array<i32>} : memref<4x32xf32, #tpu.memory_space<vmem>>, vector<4x32xf32>,
    return
  }
  func.func @transform_0(%arg0: i32) -> (i32, i32) {
    %c0_i32 = arith.constant 0 : i32
    %c0_i32_0 = arith.constant 0 : i32
    return %arg0, %c0_i32 : i32, i32
  }
  func.func @transform_1(%arg0: i32) -> (i32, i32) {
    %c0_i32 = arith.constant 0 : i32
    %c0_i32_0 = arith.constant 0 : i32
    return %arg0, %c0_i32 : i32, i32
  }
  func.func @transform_2(%arg0: i32) -> (i32, i32) {
    %c0_i32 = arith.constant 0 : i32
    %c0_i32_0 = arith.constant 0 : i32
    return %arg0, %c0_i32 : i32, i32
  }
}

</mosaic_0001>

<bundles_post_ra>
// kernel: tpu_custom_call.1
= control target key start
LH: loop header
LB: loop body
LE: loop exit
PB: predicated region body
PF: predicated region fallthrough
CT: control target
= control target key end

     0   :  { %7 = vsyncpa [#allocation3], 0  ;;  %s488_s0 = inlined_call_operand.hbm [shape: f32[4,128], index: 0, kind: input, shape index: {}]   ;;  %s489_s1 = inlined_call_operand.hbm [shape: f32[4,128], index: 1, kind: input, shape index: {}]   ;;  %s490_s2 = inlined_call_operand.hbm [shape: f32[4,32], index: 2, kind: output, shape index: {}]  }
   0x1   :  { %8 = vsyncpa [#allocation6], 0 }
   0x2   :  { %9 = vsyncpa [#allocation4], 0  ;;  %s15_s11 = sshll.u32 %s488_s0, 4  ;;  %s361_s12 = smov [#allocation2]   ;;  %s16_s11 = int_to_ptr.hbm [resolvable:$true] %s15_s11 }
   0x3   :  { %s17_s13 = sshll.u32 %s361_s12, 4  ;;  %s26_s16 = sshll.u32 %s489_s1, 4  ;;  %s18_s13 = int_to_ptr.vmem [resolvable:$true] %s17_s13  ;;  %s27_s16 = int_to_ptr.hbm [resolvable:$true] %s26_s16 }
   0x4   :  { %20 = dma.hbm_to_vmem [thread:$0]  %s16_s11, 64, %s18_s13, [#allocation3]  }
   0x5   :  { %s362_s17 = smov [#allocation5]  }
   0x6   :  { %s28_s18 = sshll.u32 %s362_s17, 4  ;;  %s29_s18 = int_to_ptr.vmem [resolvable:$true] %s28_s18 }
   0x7   :  { %31 = dma.hbm_to_vmem [thread:$0]  %s27_s16, 64, %s29_s18, [#allocation6]  }
   0x8   :  { %355 = dma.done.wait [#allocation3], 64  }
   0x9   :  { %356 = vsyncadd [#allocation3], 4294967232 }
   0xa   :  { %357 = dma.done.wait [#allocation6], 64  }
   0xb   :  { %358 = vsyncadd [#allocation6], 4294967232  ;;  %v389_v0 = vld [vmem:[#allocation2] sm:$0xf]  ;;  %s363_s0 = smov 125   ;;  %s364_s19 = smov 127   ;;  %v128_v2 = vlaneseq }
   0xc   :  { %46 = vrot.lane.b32.xlu1 %v389_v0, %s363_s0  ;;  %42 = vrot.lane.b32.xlu0 %v389_v0, %s364_s19  ;;  %v393_v1 = vld [vmem:[#allocation5] sm:$0xf]  ;;  %s365_s1 = smov 126   ;;  %v366_v8 = vmov 1.0   ;;  %s367_s20 = smov [#allocation7]  }
   0xd   :  { %50 = vrot.lane.b32.xlu2 %v393_v1, %s365_s1  ;;  %v399_v3 = vand.u32 127, %v128_v2  ;;  %v401_v4 = vshrl.u32 %v128_v2, 7  ;;  %v54_v30 = vmax.f32 %v389_v0, %v393_v1  ;;  %v90_v31 = vmin.f32 %v389_v0, %v393_v1  ;;  %s226_s21 = sshll.u32 %s367_s20, 4  ;;  %s228_s24 = sshll.u32 %s490_s2, 4  ;;  %s227_s21 = int_to_ptr.vmem [resolvable:$true] %s226_s21  ;;  %s229_s24 = int_to_ptr.hbm [resolvable:$true] %s228_s24 }
   0xe   :  { %v115_v53 = vsub.f32 %v389_v0, %v393_v1 }
   0xf   :  { %v149_v5 = vadd.s32 120, %v401_v4  ;;  %v405_v6 = vmul.u32 4, %v399_v3  ;;  %v148_v7 = vadd.s32 112, %v401_v4  ;;  %v147_v9 = vadd.s32 104, %v401_v4 }
  0x10   :  { %v146_v10 = vadd.s32 96, %v401_v4  ;;  %v145_v11 = vadd.s32 88, %v401_v4  ;;  %v144_v12 = vadd.s32 80, %v401_v4  ;;  %v143_v13 = vadd.s32 72, %v401_v4 }
  0x11   :  { %vm166_vm0 = vcmp.eq.s32.totalorder %v149_v5, %v405_v6  ;;  %vm165_vm1 = vcmp.eq.s32.totalorder %v148_v7, %v405_v6  ;;  %vm164_vm2 = vcmp.eq.s32.totalorder %v147_v9, %v405_v6  ;;  %v142_v14 = vadd.s32 64, %v401_v4 }
  0x12   :  { %255 = vmatpush.msk.msra.mxu0 %vm166_vm0, %v366_v8  ;;  %vm163_vm3 = vcmp.eq.s32.totalorder %v146_v10, %v405_v6  ;;  %vm162_vm4 = vcmp.eq.s32.totalorder %v145_v11, %v405_v6  ;;  %vm161_vm5 = vcmp.eq.s32.totalorder %v144_v12, %v405_v6  ;;  %vm160_vm6 = vcmp.eq.s32.totalorder %v143_v13, %v405_v6 }
  0x13   :  { %v141_v15 = vadd.s32 56, %v401_v4  ;;  %vm159_vm7 = vcmp.eq.s32.totalorder %v142_v14, %v405_v6  ;;  %v140_v17 = vadd.s32 48, %v401_v4  ;;  %v139_v18 = vadd.s32 40, %v401_v4 }
  0x14   :  { %48 = vrot.lane.b32.xlu1 %v393_v1, %s364_s19  ;;  %44 = vrot.lane.b32.xlu0 %v389_v0, %s365_s1  ;;  %v138_v19 = vadd.s32 32, %v401_v4  ;;  %v137_v22 = vadd.s32 24, %v401_v4  ;;  %v136_v23 = vadd.s32 16, %v401_v4  ;;  %v135_v24 = vadd.s32 8, %v401_v4 }
  0x15   :  { %52 = vrot.lane.b32.xlu2 %v393_v1, %s363_s0  ;;  %256 = vmatpush.msk.msra.mxu0 %vm165_vm1, %v366_v8  ;;  %vm158_vm8 = vcmp.eq.s32.totalorder %v141_v15, %v405_v6  ;;  %vm157_vm9 = vcmp.eq.s32.totalorder %v140_v17, %v405_v6  ;;  %vm156_vm10 = vcmp.eq.s32.totalorder %v139_v18, %v405_v6  ;;  %v116_v56 = vand.u32 2147483647, %v115_v53 }
  0x16   :  { %vm155_vm11 = vcmp.eq.s32.totalorder %v138_v19, %v405_v6  ;;  %vm154_vm12 = vcmp.eq.s32.totalorder %v137_v22, %v405_v6  ;;  %vm153_vm13 = vcmp.eq.s32.totalorder %v136_v23, %v405_v6  ;;  %vm152_vm14 = vcmp.eq.s32.totalorder %v135_v24, %v405_v6 }
  0x17   :  { %257 = vmatpush.msk.msra.mxu0 %vm164_vm2, %v366_v8  ;;  %vm151_vm15 = vcmp.eq.s32.totalorder %v401_v4, %v405_v6  ;;  %v130_v24 = vand.u32 3, %v399_v3 }
  0x19   :  { %258 = vmatpush.msk.msra.mxu0 %vm163_vm3, %v366_v8 }
  0x1b   :  { %259 = vmatpush.msk.msra.mxu0 %vm162_vm4, %v366_v8 }
  0x1d   :  { %260 = vmatpush.msk.msra.mxu0 %vm161_vm5, %v366_v8 }
  0x1f   :  { %261 = vmatpush.msk.msra.mxu0 %vm160_vm6, %v366_v8 }
  0x21   :  { %262 = vmatpush.msk.msra.mxu0 %vm159_vm7, %v366_v8 }
  0x23   :  { %263 = vmatpush.msk.msra.mxu0 %vm158_vm8, %v366_v8 }
  0x25   :  { %264 = vmatpush.msk.msra.mxu0 %vm157_vm9, %v366_v8 }
  0x27   :  { %265 = vmatpush.msk.msra.mxu0 %vm156_vm10, %v366_v8 }
  0x29   :  { %266 = vmatpush.msk.msra.mxu0 %vm155_vm11, %v366_v8  ;;  %vm131_vm11 = vcmp.eq.s32.totalorder %v130_v24, 0 }
  0x2b   :  { %267 = vmatpush.msk.msra.mxu0 %vm154_vm12, %v366_v8  ;;  %vm219_vm12 = vcmask 257024  }
  0x2d   :  { %268 = vmatpush.msk.msra.mxu0 %vm153_vm13, %v366_v8 }
  0x2f   :  { %269 = vmatpush.msk.msra.mxu0 %vm152_vm14, %v366_v8 }
  0x31   :  { %270 = vmatpush.msk.msra.mxu0 %vm151_vm15, %v366_v8 }
  0x67   :  { %v428_v16 = vpop.permute.xlu2 %50 }
  0x68   :  { %v68_v26 = vsub.f32 %v428_v16, %v393_v1 }
  0x6f   :  { %v448_v25 = vpop.permute.xlu2 %52 }
  0x7e   :  { %v438_v20 = vpop.permute.xlu1 %46  ;;  %v43_v21 = vpop.permute.xlu0 %42 }
  0x7f   :  { %v57_v27 = vmin.f32 %v438_v20, %v448_v25  ;;  %v92_v32 = vmax.f32 %v438_v20, %v448_v25  ;;  %v66_v36 = vsub.f32 %v438_v20, %v43_v21 }
  0x86   :  { %v49_v28 = vpop.permute.xlu1 %48  ;;  %v45_v29 = vpop.permute.xlu0 %44 }
  0x87   :  { %v55_v33 = vmax.f32 %v43_v21, %v49_v28  ;;  %v69_v34 = vsub.f32 %v448_v25, %v49_v28  ;;  %v93_v35 = vmin.f32 %v43_v21, %v49_v28  ;;  %v56_v37 = vmin.f32 %v45_v29, %v428_v16 }
  0x88   :  { %v65_v38 = vsub.f32 %v45_v29, %v389_v0  ;;  %v89_v39 = vmax.f32 %v45_v29, %v428_v16  ;;  %v117_v54 = vsub.f32 %v43_v21, %v49_v28  ;;  %v120_v60 = vsub.f32 %v45_v29, %v428_v16 }
  0x89   :  { %v62_v40 = vsub.f32 %v57_v27, %v55_v33  ;;  %v70_v41 = vmul.f32 %v69_v34, %v68_v26  ;;  %v94_v42 = vsub.f32 %v92_v32, %v93_v35  ;;  %vm58_vm0 = vcmp.gt.f32.partialorder %v57_v27, %v55_v33 }
  0x8a   :  { %vm59_vm1 = vcmp.gt.f32.partialorder %v56_v37, %v54_v30  ;;  %v61_v43 = vsub.f32 %v56_v37, %v54_v30  ;;  %v67_v44 = vmul.f32 %v66_v36, %v65_v38  ;;  %v91_v45 = vsub.f32 %v89_v39, %v90_v31 }
  0x8b   :  { %vm60_vm2 = vmand %vm58_vm0, %vm59_vm1  ;;  %v118_v57 = vand.u32 2147483647, %v117_v54  ;;  %v123_v0 = vsub.f32 %v438_v20, %v448_v25  ;;  %v121_v1 = vand.u32 2147483647, %v120_v60 }
  0x8c   :  { %v63_v46 = vmul.f32 %v62_v40, %v61_v43  ;;  %v71_v47 = vadd.f32 %v70_v41, %v67_v44  ;;  %v95_v48 = vmul.f32 %v94_v42, %v91_v45 }
  0x8d   :  { %v119_v63 = vadd.f32 %v118_v57, %v116_v56  ;;  %v124_v17 = vand.u32 2147483647, %v123_v0 }
  0x8e   :  { %v64_v49 = vsel %vm60_vm2, %v63_v46, 0.0  ;;  %v97_v51 = vadd.f32 1e-07, %v95_v48 }
  0x8f   :  { %v72_v50 = vsub.f32 %v71_v47, %v64_v49  ;;  %v122_v11 = vadd.f32 %v121_v1, %v119_v63 }
  0x90   :  { %279 = vrcp.f32 %v97_v51  ;;  %v109_v2 = vand.u32 2147483648, %v97_v51  ;;  %v107_v6 = vand.u32 2147483647, %v97_v51  ;;  %vm103_vm4 = vweird.f32 %v97_v51 }
  0x91   :  { %v73_v52 = vadd.f32 1e-07, %v72_v50  ;;  %v96_v18 = vsub.f32 %v95_v48, %v72_v50  ;;  %v125_v23 = vadd.f32 %v124_v17, %v122_v11 }
  0x92   :  { %v110_v12 = vor.u32 1.1754944e-38, %v109_v2  ;;  %vm108_vm8 = vcmp.eq.f32.partialorder %v107_v6, 8.507059e+37 }
  0x93   :  { %281 = vrcp.f32 %v73_v52  ;;  %v85_v7 = vand.u32 2147483648, %v73_v52  ;;  %v83_v9 = vand.u32 2147483647, %v73_v52  ;;  %vm79_vm7 = vweird.f32 %v73_v52 }
  0x94   :  { %v126_v27 = vmul.f32 0.25, %v125_v23 }
  0x95   :  { %v86_v15 = vor.u32 1.1754944e-38, %v85_v7  ;;  %vm84_vm10 = vcmp.eq.f32.partialorder %v83_v9, 8.507059e+37 }
  0x96   :  { %v280_v55 = vpop.eup %279 }
  0x97   :  { %v99_v58 = vmul.f32 %v280_v55, %v97_v51  ;;  %vm104_vm3 = vweird.f32 %v280_v55 }
  0x98   :  { %vm105_vm6 = vmor %vm103_vm4, %vm104_vm3 }
  0x99   :  { %v282_v59 = vpop.eup %281  ;;  %v100_v62 = vsub.f32 1.0, %v99_v58 }
  0x9a   :  { %v75_v61 = vmul.f32 %v282_v59, %v73_v52  ;;  %vm80_vm5 = vweird.f32 %v282_v59 }
  0x9b   :  { %v101_v5 = vmul.f32 %v280_v55, %v100_v62  ;;  %vm81_vm9 = vmor %vm79_vm7, %vm80_vm5 }
  0x9c   :  { %v76_v4 = vsub.f32 1.0, %v75_v61 }
  0x9d   :  { %v102_v10 = vadd.f32 %v280_v55, %v101_v5 }
  0x9e   :  { %v77_v8 = vmul.f32 %v282_v59, %v76_v4 }
  0x9f   :  { %v106_v14 = vsel %vm105_vm6, %v280_v55, %v102_v10 }
  0xa0   :  { %v78_v13 = vadd.f32 %v282_v59, %v77_v8  ;;  %v111_v16 = vsel %vm108_vm8, %v110_v12, %v106_v14 }
  0xa1   :  { %v112_v22 = vmul.f32 %v111_v16, %v96_v18 }
  0xa2   :  { %v82_v19 = vsel %vm81_vm9, %v282_v59, %v78_v13 }
  0xa3   :  { %v87_v20 = vsel %vm84_vm10, %v86_v15, %v82_v19 }
  0xa4   :  { %v88_v21 = vmul.f32 %v87_v20, %v64_v49 }
  0xa6   :  { %v113_v25 = vsub.f32 %v88_v21, %v112_v22 }
  0xa8   :  { %v114_v26 = vsub.f32 1.0, %v113_v25 }
  0xaa   :  { %v127_v28 = vadd.f32 %v126_v27, %v114_v26 }
  0xac   :  { %271 = vmatmul.msk.f32.vlgmr.msra.gmra.mxu0 %vm131_vm11, %v127_v28 }
 0x129   :  { %v216_v29 = vpop.f32.mrf.mxu0 }
 0x12a   :  { %220 = vst.msk [vmem:[#allocation7] sm:$0xf] %vm219_vm12, %v216_v29 }
 0x12b   :  { %231 = dma.vmem_to_hbm [thread:$0]  %s227_s21, 64, %s229_s24, [#allocation4]  }
 0x12c   :  { %359 = dma.done.wait [#allocation4], 64  }
 0x12d   :  { %360 = vsyncadd [#allocation4], 4294967232 }
 0x12e   :  { %236 = vsyncpa [#allocation3], 1 }
 0x12f   :  { %237 = vsyncpa [#allocation6], 1 }
 0x130   :  { %238 = vsyncpa [#allocation4], 1 }

</bundles_post_ra>
